<compile_context>
chip_gen: v7x
topology: tpu7x:2x2x1
jax: 0.10.0
libtpu: 0.0.40
codegen_flags: <defaults>
</compile_context>

<pallas_src>
import functools

import jax
import jax.numpy as jnp
from jax.experimental import pallas as pl
from jax.experimental.pallas import tpu as pltpu

EPS = 0.1
IGNORE_INDEX = -100


def _round_up(x, m):
    return (x + m - 1) // m * m


def _default_vmem_limit_bytes():
    """Per-generation scoped VMEM limit: ~100 MiB on 128 MiB parts, ~56 MiB on 64 MiB (v7x/TC)."""
    try:
        cap = int(pltpu.get_tpu_info().vmem_capacity_bytes)
    except Exception:  # pragma: no cover - conservative fallback (v7x per-TC size)
        cap = 64 * 1024 * 1024
    return min(cap * 7 // 8, 100 * 1024 * 1024)


def _lsce_tile_kernel(logits_ref, target_ref, part_ref, *, tile_n, n_rows, n_classes, chunk):
    """One row-tile of the loss, streamed over C in chunks with an online-LSE carry.

    logits_ref: (tile_n, C) in the input dtype (bf16/f32) -- chunks cast to f32 in vregs.
    target_ref: (tile_n, 1) int32.
    part_ref:   (8, 128) f32 per-tile partials; lane 0 = smooth_sum, 1 = nll_sum, 2 = valid_cnt.
    """
    # ---- hoisted per-row masks / targets (outside the chunk loop) -------------------------
    tgt = target_ref[...]                                             # (T, 1) int32
    row_ids = (pl.program_id(0) * tile_n
               + jax.lax.broadcasted_iota(jnp.int32, (tile_n, 1), 0))
    in_range = row_ids < n_rows                                       # (T, 1) bool
    valid = jnp.logical_and(tgt != IGNORE_INDEX, in_range)            # (T, 1) bool

    n_full = n_classes // chunk
    rem = n_classes - n_full * chunk
    iota_w = chunk if n_full > 0 else rem
    col_iota = jax.lax.broadcasted_iota(jnp.int32, (1, iota_w), 1)    # hoisted, (1, chunk)

    # ---- online-LSE carry over C-chunks ----------------------------------------------------
    m0 = jnp.full((tile_n, 1), -1e30, jnp.float32)                    # finite "−inf" (no NaN)
    z0 = jnp.zeros((tile_n, 1), jnp.float32)
    carry = (m0, z0, z0, z0)                                          # (max, sumexp, sum_x, picked)

    def step(x_c, c0, width, carry):
        m, s, sx, pk = carry
        cmax = jnp.max(x_c, axis=-1, keepdims=True)
        m_new = jnp.maximum(m, cmax)
        s = s * jnp.exp(m - m_new) + jnp.sum(jnp.exp(x_c - m_new), axis=-1, keepdims=True)
        sx = sx + jnp.sum(x_c, axis=-1, keepdims=True)
        ci = col_iota if width == col_iota.shape[1] else col_iota[:, :width]
        hit = ci == (tgt - c0)                                        # (T, width) via broadcast
        pk = pk + jnp.sum(jnp.where(hit, x_c, 0.0), axis=-1, keepdims=True)
        return m_new, s, sx, pk

    if n_full > 0:
        if n_full <= 8:
            # Short trip count: fully unrolled static slices.
            for k in range(n_full):
                x_c = logits_ref[:, k * chunk:(k + 1) * chunk].astype(jnp.float32)
                carry = step(x_c, k * chunk, chunk, carry)
        else:
            def body(k, carry):
                c0 = pl.multiple_of(k * chunk, chunk)
                x_c = logits_ref[:, pl.ds(c0, chunk)].astype(jnp.float32)
                return step(x_c, c0, chunk, carry)
            carry = jax.lax.fori_loop(0, n_full, body, carry)

    if rem > 0:
        c0 = n_full * chunk
        x_c = logits_ref[:, c0:].astype(jnp.float32)
        carry = step(x_c, c0, rem, carry)

    m, s, sx, pk = carry
    lse = m + jnp.log(s)                                              # (T, 1)

    # sum over rows of (-sum_c log_pred) and of (-log_pred[target]).
    # NOTE: masking happens BEFORE the row sums, so garbage contents of the ragged last
    # tile (logits are NOT padded by the wrapper) cannot leak into the result.
    c_f = jnp.float32(n_classes)
    smooth_sum = jnp.sum(jnp.where(in_range, c_f * lse - sx, 0.0))
    nll_sum = jnp.sum(jnp.where(valid, lse - pk, 0.0))
    valid_cnt = jnp.sum(valid.astype(jnp.float32))

    # Lane-dense (8, 128) partial slab: unmasked vst, one block per grid step ("parallel" safe).
    lane = jax.lax.broadcasted_iota(jnp.int32, (8, 128), 1)
    part_ref[...] = (jnp.where(lane == 0, smooth_sum, 0.0)
                     + jnp.where(lane == 1, nll_sum, 0.0)
                     + jnp.where(lane == 2, valid_cnt, 0.0))


def label_smoothing_cross_entropy(logits, targets, *, tile_n=None, chunk=512,
                                  vmem_limit_bytes=None):
    """logits: (N, C) float (bf16 or f32, used as-is), targets: (N,) int. Scalar f32 loss."""
    n, c = logits.shape
    itemsize = jnp.dtype(logits.dtype).itemsize

    if vmem_limit_bytes is None:
        vmem_limit_bytes = _default_vmem_limit_bytes()
    vmem_limit_bytes = int(vmem_limit_bytes)

    if tile_n is None:
        # Byte-sized tiles: double-buffered native-dtype input + ~2 chunk-wide f32 temps per row.
        chunk_eff = min(chunk, c)
        per_row = 2 * c * itemsize + 2 * chunk_eff * 4 + 64
        budget = (vmem_limit_bytes * 3) // 4
        tile_n = budget // per_row
    tile_n = int(tile_n)
    tile_n = max(8, (tile_n // 8) * 8)          # (8, 128) sublane constraint
    tile_n = min(tile_n, _round_up(n, 8))
    # Keep >= 2 grid steps when there are enough rows so v7x's second TensorCore gets work.
    if tile_n >= n and n > 8:
        tile_n = min(tile_n, _round_up((n + 1) // 2, 8))

    num_tiles = -(-n // tile_n)                  # cdiv; ragged last tile masked in-kernel

    tgt2d = targets.astype(jnp.int32).reshape(n, 1)

    kernel = functools.partial(_lsce_tile_kernel, tile_n=tile_n, n_rows=n,
                               n_classes=c, chunk=int(chunk))

    parts = pl.pallas_call(
        kernel,
        out_shape=jax.ShapeDtypeStruct((num_tiles * 8, 128), jnp.float32),
        grid=(num_tiles,),
        in_specs=[
            pl.BlockSpec((tile_n, c), lambda i: (i, 0)),
            pl.BlockSpec((tile_n, 1), lambda i: (i, 0)),
        ],
        out_specs=pl.BlockSpec((8, 128), lambda i: (i, 0)),
        compiler_params=pltpu.CompilerParams(
            dimension_semantics=("parallel",),
            vmem_limit_bytes=vmem_limit_bytes,
        ),
    )(logits, tgt2d)

    parts = parts.reshape(num_tiles, 8, 128)[:, 0, :]             # (num_tiles, 128)
    smooth_sum = jnp.sum(parts[:, 0])
    nll_sum = jnp.sum(parts[:, 1])
    valid_cnt = jnp.sum(parts[:, 2])

    smooth_mean = smooth_sum / n
    # NOTE: if every row is ignore_index this is 0/0 = NaN, matching torch nll_loss('mean').
    nll_mean = nll_sum / valid_cnt
    return smooth_mean * (EPS / c) + (1.0 - EPS) * nll_mean


def _reference(logits, targets):
    c = logits.shape[-1]
    log_pred = jax.nn.log_softmax(logits.astype(jnp.float32), axis=-1)
    smooth = -log_pred.sum(axis=-1).mean()
    valid = targets != IGNORE_INDEX
    safe_t = jnp.clip(targets, 0, None)
    picked = jnp.take_along_axis(log_pred, safe_t[:, None], axis=1)[:, 0]
    nll = jnp.sum(jnp.where(valid, -picked, 0.0)) / jnp.sum(valid.astype(jnp.float32))
    return smooth * EPS / c + (1.0 - EPS) * nll


if __name__ == "__main__":
    key = jax.random.PRNGKey(0)
    k1, k2, k3, k4 = jax.random.split(key, 4)

    # Case 1: bf16 logits, single tile (native-dtype HBM read + in-kernel per-chunk f32 cast).
    N, C = 8, 32
    logits = jax.random.normal(k1, (N, C), dtype=jnp.float32).astype(jnp.bfloat16)
    targets = jax.random.randint(k2, (N,), 0, C, dtype=jnp.int32)
    targets = targets.at[3].set(IGNORE_INDEX)           # exercise ignore_index path

    loss = label_smoothing_cross_entropy(logits, targets)
    jax.block_until_ready(loss)
    ref = _reference(logits, targets)
    assert jnp.allclose(loss, ref, rtol=2e-5, atol=2e-5), (loss, ref)

    # Case 2: f32 logits, N not a multiple of the tile -> multi-tile grid + unpadded ragged tail.
    N2, C2, TILE = 20, 32, 8
    logits2 = jax.random.normal(k3, (N2, C2), dtype=jnp.float32)
    targets2 = jax.random.randint(k4, (N2,), 0, C2, dtype=jnp.int32)
    targets2 = targets2.at[0].set(IGNORE_INDEX)
    targets2 = targets2.at[11].set(IGNORE_INDEX)

    loss2 = label_smoothing_cross_entropy(logits2, targets2, tile_n=TILE)
    jax.block_until_ready(loss2)
    ref2 = _reference(logits2, targets2)
    assert jnp.allclose(loss2, ref2, rtol=2e-5, atol=2e-5), (loss2, ref2)

    print("KERNEL_OK")
</pallas_src>

<mosaic_0001>
module attributes {stable_mosaic.version = 11 : i64} {
  func.func @_lsce_tile_kernel(%arg0: i32, %arg1: memref<8x32xbf16, #tpu.memory_space<vmem>>, %arg2: memref<8x1xi32, #tpu.memory_space<vmem>>, %arg3: memref<8x128xf32, #tpu.memory_space<vmem>>) attributes {dimension_semantics = [#tpu.dimension_semantics<parallel>], iteration_bounds = array<i64: 1>, scalar_prefetch = 0 : i64, scratch_operands = 0 : i64, tpu.core_type = #tpu.core_type<tc>, window_params = [{transform_indices = @transform_0, window_bounds = array<i64: 8, 32>}, {transform_indices = @transform_1, window_bounds = array<i64: 8, 1>}, {transform_indices = @transform_2, window_bounds = array<i64: 8, 128>}]} {
    %c0 = arith.constant 0 : index
    %c0_0 = arith.constant 0 : index
    %0 = vector.load %arg2[%c0, %c0_0] : memref<8x1xi32, #tpu.memory_space<vmem>>, vector<8x1xi32>
    %c8_i32 = arith.constant 8 : i32
    %1 = arith.muli %arg0, %c8_i32 : i32
    %2 = tpu.iota {dimensions = array<i32: 0>} : vector<8x1xi32>
    %3 = vector.broadcast %1 : i32 to vector<8x1xi32>
    %4 = arith.addi %3, %2 : vector<8x1xi32>
    %c8_i32_1 = arith.constant 8 : i32
    %5 = vector.broadcast %c8_i32_1 : i32 to vector<8x1xi32>
    %6 = arith.cmpi slt, %4, %5 : vector<8x1xi32>
    %c-100_i32 = arith.constant -100 : i32
    %7 = vector.broadcast %c-100_i32 : i32 to vector<8x1xi32>
    %8 = arith.cmpi ne, %0, %7 : vector<8x1xi32>
    %9 = arith.andi %8, %6 : vector<8x1xi1>
    %10 = tpu.iota {dimensions = array<i32: 1>} : vector<1x32xi32>
    %cst = arith.constant -1.000000e+30 : f32
    %11 = vector.broadcast %cst : f32 to vector<8x1xf32>
    %cst_2 = arith.constant 0.000000e+00 : f32
    %12 = vector.broadcast %cst_2 : f32 to vector<8x1xf32>
    %c0_3 = arith.constant 0 : index
    %c0_4 = arith.constant 0 : index
    %13 = vector.load %arg1[%c0_3, %c0_4] : memref<8x32xbf16, #tpu.memory_space<vmem>>, vector<8x32xbf16>
    %14 = arith.extf %13 : vector<8x32xbf16> to vector<8x32xf32>
    %cst_5 = arith.constant dense<0xFF800000> : vector<8xf32>
    %15 = vector.multi_reduction <maximumf>, %14, %cst_5 [1] : vector<8x32xf32> to vector<8xf32>
    %16 = vector.shape_cast %15 : vector<8xf32> to vector<8x1xf32>
    %17 = arith.maximumf %11, %16 : vector<8x1xf32>
    %18 = arith.subf %11, %17 : vector<8x1xf32>
    %19 = math.exp %18 : vector<8x1xf32>
    %20 = arith.mulf %12, %19 : vector<8x1xf32>
    %21 = vector.broadcast %17 : vector<8x1xf32> to vector<8x32xf32>
    %22 = arith.subf %14, %21 : vector<8x32xf32>
    %23 = math.exp %22 : vector<8x32xf32>
    %cst_6 = arith.constant dense<0.000000e+00> : vector<8xf32>
    %24 = vector.multi_reduction <add>, %23, %cst_6 [1] : vector<8x32xf32> to vector<8xf32>
    %25 = vector.shape_cast %24 : vector<8xf32> to vector<8x1xf32>
    %26 = arith.addf %20, %25 : vector<8x1xf32>
    %cst_7 = arith.constant dense<0.000000e+00> : vector<8xf32>
    %27 = vector.multi_reduction <add>, %14, %cst_7 [1] : vector<8x32xf32> to vector<8xf32>
    %28 = vector.shape_cast %27 : vector<8xf32> to vector<8x1xf32>
    %29 = arith.addf %12, %28 : vector<8x1xf32>
    %c0_i32 = arith.constant 0 : i32
    %30 = vector.broadcast %c0_i32 : i32 to vector<8x1xi32>
    %31 = arith.subi %0, %30 : vector<8x1xi32>
    %32 = vector.broadcast %10 : vector<1x32xi32> to vector<8x32xi32>
    %33 = vector.broadcast %31 : vector<8x1xi32> to vector<8x32xi32>
    %34 = arith.cmpi eq, %32, %33 : vector<8x32xi32>
    %cst_8 = arith.constant 0.000000e+00 : f32
    %35 = vector.broadcast %cst_8 : f32 to vector<8x32xf32>
    %36 = arith.select %34, %14, %35 : vector<8x32xi1>, vector<8x32xf32>
    %cst_9 = arith.constant dense<0.000000e+00> : vector<8xf32>
    %37 = vector.multi_reduction <add>, %36, %cst_9 [1] : vector<8x32xf32> to vector<8xf32>
    %38 = vector.shape_cast %37 : vector<8xf32> to vector<8x1xf32>
    %39 = arith.addf %12, %38 : vector<8x1xf32>
    %40 = math.log %26 : vector<8x1xf32>
    %41 = arith.addf %17, %40 : vector<8x1xf32>
    %cst_10 = arith.constant 3.200000e+01 : f32
    %42 = vector.broadcast %cst_10 : f32 to vector<8x1xf32>
    %43 = arith.mulf %42, %41 : vector<8x1xf32>
    %44 = arith.subf %43, %29 : vector<8x1xf32>
    %cst_11 = arith.constant 0.000000e+00 : f32
    %45 = vector.broadcast %cst_11 : f32 to vector<8x1xf32>
    %46 = arith.select %6, %44, %45 : vector<8x1xi1>, vector<8x1xf32>
    %47 = vector.shape_cast %46 : vector<8x1xf32> to vector<1x8x1xf32>
    %cst_12 = arith.constant dense<0.000000e+00> : vector<1xf32>
    %48 = vector.multi_reduction <add>, %47, %cst_12 [1, 2] : vector<1x8x1xf32> to vector<1xf32>
    %49 = vector.shape_cast %48 : vector<1xf32> to vector<1x1x1xf32>
    %50 = vector.extract %49[0, 0, 0] : f32 from vector<1x1x1xf32>
    %51 = arith.subf %41, %39 : vector<8x1xf32>
    %cst_13 = arith.constant 0.000000e+00 : f32
    %52 = vector.broadcast %cst_13 : f32 to vector<8x1xf32>
    %53 = arith.select %9, %51, %52 : vector<8x1xi1>, vector<8x1xf32>
    %54 = vector.shape_cast %53 : vector<8x1xf32> to vector<1x8x1xf32>
    %cst_14 = arith.constant dense<0.000000e+00> : vector<1xf32>
    %55 = vector.multi_reduction <add>, %54, %cst_14 [1, 2] : vector<1x8x1xf32> to vector<1xf32>
    %56 = vector.shape_cast %55 : vector<1xf32> to vector<1x1x1xf32>
    %57 = vector.extract %56[0, 0, 0] : f32 from vector<1x1x1xf32>
    %58 = arith.extui %9 : vector<8x1xi1> to vector<8x1xi32>
    %59 = arith.sitofp %58 : vector<8x1xi32> to vector<8x1xf32>
    %60 = vector.shape_cast %59 : vector<8x1xf32> to vector<1x8x1xf32>
    %cst_15 = arith.constant dense<0.000000e+00> : vector<1xf32>
    %61 = vector.multi_reduction <add>, %60, %cst_15 [1, 2] : vector<1x8x1xf32> to vector<1xf32>
    %62 = vector.shape_cast %61 : vector<1xf32> to vector<1x1x1xf32>
    %63 = vector.extract %62[0, 0, 0] : f32 from vector<1x1x1xf32>
    %64 = tpu.iota {dimensions = array<i32: 1>} : vector<8x128xi32>
    %c0_i32_16 = arith.constant 0 : i32
    %65 = vector.broadcast %c0_i32_16 : i32 to vector<8x128xi32>
    %66 = arith.cmpi eq, %64, %65 : vector<8x128xi32>
    %cst_17 = arith.constant 0.000000e+00 : f32
    %67 = vector.broadcast %50 : f32 to vector<8x128xf32>
    %68 = vector.broadcast %cst_17 : f32 to vector<8x128xf32>
    %69 = arith.select %66, %67, %68 : vector<8x128xi1>, vector<8x128xf32>
    %c1_i32 = arith.constant 1 : i32
    %70 = vector.broadcast %c1_i32 : i32 to vector<8x128xi32>
    %71 = arith.cmpi eq, %64, %70 : vector<8x128xi32>
    %cst_18 = arith.constant 0.000000e+00 : f32
    %72 = vector.broadcast %57 : f32 to vector<8x128xf32>
    %73 = vector.broadcast %cst_18 : f32 to vector<8x128xf32>
    %74 = arith.select %71, %72, %73 : vector<8x128xi1>, vector<8x128xf32>
    %75 = arith.addf %69, %74 : vector<8x128xf32>
    %c2_i32 = arith.constant 2 : i32
    %76 = vector.broadcast %c2_i32 : i32 to vector<8x128xi32>
    %77 = arith.cmpi eq, %64, %76 : vector<8x128xi32>
    %cst_19 = arith.constant 0.000000e+00 : f32
    %78 = vector.broadcast %63 : f32 to vector<8x128xf32>
    %79 = vector.broadcast %cst_19 : f32 to vector<8x128xf32>
    %80 = arith.select %77, %78, %79 : vector<8x128xi1>, vector<8x128xf32>
    %81 = arith.addf %75, %80 : vector<8x128xf32>
    %c0_20 = arith.constant 0 : index
    %c0_21 = arith.constant 0 : index
    %82 = vector.load %arg3[%c0_20, %c0_21] : memref<8x128xf32, #tpu.memory_space<vmem>>, vector<8x128xf32>
    tpu.vector_store %arg3[%c0_20, %c0_21], %81 {strides = array<i32>} : memref<8x128xf32, #tpu.memory_space<vmem>>, vector<8x128xf32>,
    return
  }
  func.func @transform_0(%arg0: i32) -> (i32, i32) {
    %c0_i32 = arith.constant 0 : i32
    %c0_i32_0 = arith.constant 0 : i32
    return %arg0, %c0_i32 : i32, i32
  }
  func.func @transform_1(%arg0: i32) -> (i32, i32) {
    %c0_i32 = arith.constant 0 : i32
    %c0_i32_0 = arith.constant 0 : i32
    return %arg0, %c0_i32 : i32, i32
  }
  func.func @transform_2(%arg0: i32) -> (i32, i32) {
    %c0_i32 = arith.constant 0 : i32
    %c0_i32_0 = arith.constant 0 : i32
    return %arg0, %c0_i32 : i32, i32
  }
}

</mosaic_0001>

<bundles_post_ra>
// kernel: tpu_custom_call.1
= control target key start
LH: loop header
LB: loop body
LE: loop exit
PB: predicated region body
PF: predicated region fallthrough
CT: control target
= control target key end

     0   :  { %vm25_vm0 = vcmask 261120   ;;  %v162_v2 = vmov 0   ;;  %s208_s0 = inlined_call_operand.vmem [shape: bf16[8,32], index: 0, kind: input, shape index: {}]   ;;  %s209_s1 = inlined_call_operand.vmem [shape: s32[8,1], index: 1, kind: input, shape index: {}]   ;;  %s210_s2 = inlined_call_operand.hbm [shape: f32[8,128], index: 2, kind: output, shape index: {}]  }
   0x1   :  { %v23_v0 = vld [vmem:[%s208_s0] sm:$0xf]  ;;  %131 = vset.pattern.permute.xlu0 %v162_v2 }
   0x2   :  { %v24_v1 = vunpack.c.l.bf16 %v23_v0 }
   0x3   :  { %7 = vsyncpa [#allocation3], 0  ;;  %v12_v4 = vld [vmem:[%s209_s1] sm:$0xff]  ;;  %v21_v9 = vlaneseq  ;;  %vm60_vm3 = vcmask 7168   ;;  %v163_v33 = vmov 0.0   ;;  %s164_s14 = smov [#allocation2]  }
   0x4   :  { %v26_v3 = vsel %vm25_vm0, %v24_v1, -inf  ;;  %v41_v16 = vsel %vm25_vm0, %v24_v1, 0.0  ;;  %vm19_vm2 = vcmp.ne.s32.totalorder %v12_v4, 4294967196  ;;  %s113_s15 = sshll.u32 %s164_s14, 4  ;;  %s114_s15 = int_to_ptr.vmem [resolvable:$true] %s113_s15 }
   0x5   :  { %27 = vmax.xlane.f32.xlu0 %v26_v3  ;;  %v187_v10 = vand.u32 127, %v21_v9  ;;  %v121_v34 = vsel %vm19_vm2, 1.0, %v163_v33  ;;  %s138_s16 = scalar_lea.vmem %s114_s15, 128  ;;  %p143_p1 = scmp.lt.s32.totalorder %s114_s15, %s114_s15 }
   0x6   :  { %v85_v36 = vsel %vm60_vm3, %v121_v34, 0.0  ;;  %p139_p0 = scmp.ne.s32.totalorder %s114_s15, %s138_s16  ;;  %p144_p2 = scmp.lt.s32.totalorder %s138_s16, %s138_s16 }
   0x7   :  { %vm95_vm4 = vcmp.eq.s32.totalorder %v187_v10, 0  ;;  %vm98_vm5 = vcmp.eq.s32.totalorder %v187_v10, 1  ;;  %vm102_vm6 = vcmp.eq.s32.totalorder %v187_v10, 2 }
   0x8   :  { %p145_p3 = por %p144_p2, %p143_p1 }
   0xa   :  { %p146_p4 = pnand %p145_p3, %p139_p0 }
  0x1b   :  { %46 = vperm.xlu0 %131, %v12_v4  }
  0x92   :  { %v28_v5 = vpop.xlane.xlu0 %27 }
  0x93   :  { %v29_v6 = vmax.f32 %v28_v5, -1e+30 }
  0x95   :  { %v34_v7 = vsub.f32 %v24_v1, %v29_v6  ;;  %v30_v17 = vsub.f32 -1e+30, %v29_v6 }
  0x97   :  { %v35_v8 = vmul.f32 1.442695, %v34_v7  ;;  %v31_v18 = vmul.f32 1.442695, %v30_v17 }
  0x99   :  { %132 = vpow2.f32 %v35_v8 }
  0x9a   :  { %v47_v11 = vpop.permute.xlu0 %46  ;;  %134 = vpow2.f32 %v31_v18 }
  0x9b   :  { %vm48_vm1 = vcmp.eq.s32.totalorder %v187_v10, %v47_v11 }
  0x9c   :  { %v49_v13 = vsel %vm48_vm1, %v24_v1, 0.0 }
  0x9d   :  { %v50_v15 = vsel %vm25_vm0, %v49_v13, 0.0 }
  0xa3   :  { %v133_v12 = vpop.eup %132 }
  0xa4   :  { %v37_v14 = vsel %vm25_vm0, %v133_v12, 0.0  ;;  %v135_v19 = vpop.eup %134 }
  0xa5   :  { %38 = vadd.xlane.f32.xlu1 %v37_v14  ;;  %v33_v20 = vmul.f32 0.0, %v135_v19 }
  0xa9   :  { %51 = vadd.xlane.f32.xlu1 %v50_v15 }
  0xad   :  { %42 = vadd.xlane.f32.xlu1 %v41_v16 }
 0x132   :  { %v39_v21 = vpop.xlane.xlu1 %38 }
 0x133   :  { %v40_v22 = vadd.f32 %v39_v21, %v33_v20 }
 0x135   :  { %136 = vlog2.f32 %v40_v22 }
 0x136   :  { %v52_v23 = vpop.xlane.xlu1 %51 }
 0x13a   :  { %v43_v29 = vpop.xlane.xlu1 %42 }
 0x13f   :  { %v137_v24 = vpop.eup %136 }
 0x140   :  { %v55_v25 = vmul.f32 0.6931472, %v137_v24 }
 0x142   :  { %v56_v26 = vadd.f32 %v55_v25, %v29_v6 }
 0x144   :  { %v71_v27 = vsub.f32 %v56_v26, %v52_v23  ;;  %v57_v28 = vmul.f32 32.0, %v56_v26 }
 0x146   :  { %v72_v30 = vsel %vm19_vm2, %v71_v27, 0.0  ;;  %v58_v31 = vsub.f32 %v57_v28, %v43_v29 }
 0x147   :  { %v73_v32 = vsel %vm60_vm3, %v72_v30, 0.0 }
 0x148   :  { %74 = vadd.xlane.f32.xlu1 %v73_v32  ;;  %v61_v35 = vsel %vm60_vm3, %v58_v31, 0.0 }
 0x14c   :  { %62 = vadd.xlane.f32.xlu1 %v61_v35 }
 0x150   :  { %86 = vadd.xlane.f32.xlu1 %v85_v36 }
 0x1d5   :  { %v75_v37 = vpop.xlane.xlu1 %74 }
 0x1d6   :  { %v76_v38 = vrot.slane %v75_v37, 4 }
 0x1d8   :  { %v77_v39 = vadd.f32 %v76_v38, %v75_v37 }
 0x1d9   :  { %v63_v40 = vpop.xlane.xlu1 %62 }
 0x1da   :  { %v78_v41 = vrot.slane %v77_v39, 2  ;;  %v64_v42 = vrot.slane %v63_v40, 4 }
 0x1dc   :  { %v65_v43 = vadd.f32 %v64_v42, %v63_v40  ;;  %v79_v45 = vadd.f32 %v78_v41, %v77_v39 }
 0x1dd   :  { %v87_v44 = vpop.xlane.xlu1 %86 }
 0x1de   :  { %v66_v46 = vrot.slane %v65_v43, 2  ;;  %v88_v47 = vrot.slane %v87_v44, 4  ;;  %v80_v50 = vrot.slane %v79_v45, 1 }
 0x1e0   :  { %v89_v48 = vadd.f32 %v88_v47, %v87_v44  ;;  %v67_v49 = vadd.f32 %v66_v46, %v65_v43  ;;  %v81_v55 = vadd.f32 %v80_v50, %v79_v45 }
 0x1e2   :  { %v90_v51 = vrot.slane %v89_v48, 2  ;;  %v68_v52 = vrot.slane %v67_v49, 1 }
 0x1e4   :  { %v91_v53 = vadd.f32 %v90_v51, %v89_v48  ;;  %v69_v54 = vadd.f32 %v68_v52, %v67_v49 }
 0x1e6   :  { %122 = vpush %v69_v54  ;;  %v92_v56 = vrot.slane %v91_v53, 1 }
 0x1e7   :  { %124 = vpush %v81_v55 }
 0x1e8   :  { %v93_v57 = vadd.f32 %v92_v56, %v91_v53 }
 0x1ea   :  { %126 = vpush %v93_v57 }
 0x217   :  { %s123_s0 = spop %122 }
 0x218   :  { %v96_v58 = vstv %s123_s0  ;;  %s125_s1 = spop %124 }
 0x219   :  { %v97_v59 = vsel %vm95_vm4, %v96_v58, 0.0  ;;  %v99_v60 = vstv %s125_s1 }
 0x21a   :  { %v100_v61 = vsel %vm98_vm5, %v99_v60, 0.0 }
 0x21b   :  { %s127_s13 = spop %126  ;;  %v101_v62 = vadd.f32 %v100_v61, %v97_v59 }
 0x21c   :  { %v103_v63 = vstv %s127_s13 }
 0x21d   :  { %v104_v0 = vsel %vm102_vm6, %v103_v63, 0.0 }
 0x21e   :  { %v105_v1 = vadd.f32 %v104_v0, %v101_v62 }
 0x220   :  { %106 = vst [vmem:[#allocation2] sm:$0xff] %v105_v1 }
 0x221   :  { %149 = shalt.err (!%p146_p4)
}
 0x222   :  { %s150_s19 = scalar_lea.hbm %s210_s2, 128 }
 0x223   :  { %p151_p5 = scmp.ne.s32.totalorder %s210_s2, %s150_s19  ;;  %p154_p6 = scmp.lt.u32.totalorder %s150_s19, %s210_s2 }
 0x225   :  { %p156_p7 = pnand %p154_p6, %p151_p5 }
 0x227   :  { %159 = shalt.err (!%p156_p7)
}
 0x228   :  { %116 = dma.vmem_to_hbm [thread:$0]  %s114_s15, 128, %s210_s2, [#allocation3]  }
 0x229   :  { %160 = dma.done.wait [#allocation3], 128  }
 0x22a   :  { %161 = vsyncadd [#allocation3], 4294967168 }
 0x22b   :  { %120 = vsyncpa [#allocation3], 1 }

</bundles_post_ra>
